<compile_context>
chip_gen: v6e
topology: v6e:2x2x1
jax: 0.10.0
libtpu: 0.0.40
codegen_flags: <defaults>
</compile_context>

<pallas_src>
import functools

import jax
import jax.numpy as jnp
from jax import lax
from jax.experimental import pallas as pl
from jax.experimental.pallas import tpu as pltpu

HIDDEN = 64
LANE = 128
HIDDEN_PAD = 128  # hidden padded to one full lane width


def _round_up(a, m):
    return ((a + m - 1) // m) * m


def _softplus(x):
    # Matches torch.nn.functional.softplus (beta=1, threshold=20):
    # returns x where x > 20, else log1p(exp(x)).
    return jnp.where(x > 20.0, x, jnp.log1p(jnp.exp(jnp.minimum(x, 20.0))))


def actor_kernel(x_ref, w1_ref, b1_ref, wh_ref, bh_ref, out_ref, *, outp):
    # Hidden layer: Linear(inp, 64) + ReLU.  bf16 MXU operands, f32 accumulate,
    # f32 elementwise.  Hidden is padded to 128 lanes (padded lanes are exact
    # zeros: zero weight columns + zero bias lanes -> relu(0) = 0).
    h = jnp.dot(x_ref[...], w1_ref[...], preferred_element_type=jnp.float32)
    h = jnp.maximum(h + b1_ref[...], 0.0)

    # Fused mean/std heads: one matmul into a lane-dense 128-wide slab.
    # Padded hidden rows of wh are zero, so they contribute nothing.
    z = jnp.dot(h.astype(wh_ref.dtype), wh_ref[...],
                preferred_element_type=jnp.float32)
    z = z + bh_ref[...]

    # Columns [0, outp) -> tanh (mean), [outp, 2*outp) -> softplus (std);
    # padded lanes hold don't-care values and are sliced off in the wrapper.
    col = lax.broadcasted_iota(jnp.int32, z.shape, 1)
    out_ref[...] = jnp.where(col < outp, jnp.tanh(z), _softplus(z))


def actor_net_forward(x, params):
    """x: (B, inp) float32. params: dict from init_actor_params."""
    B, inp = x.shape
    outp = params["wm"].shape[1]
    head_pad = _round_up(max(2 * outp, LANE), LANE)

    # Batch tile: multiple of 8 sublanes, capped at 512 rows; pad batch to a
    # whole number of tiles (padded rows are zeros and discarded afterwards).
    TB = min(512, _round_up(B, 8))
    B_pad = _round_up(B, TB)

    x_p = jnp.pad(x, ((0, B_pad - B), (0, 0))).astype(jnp.bfloat16)

    # W1 / b1 zero-padded along the hidden axis to 128 lanes.
    w1 = jnp.pad(params["w1"], ((0, 0), (0, HIDDEN_PAD - HIDDEN))
                 ).astype(jnp.bfloat16)
    b1 = jnp.pad(params["b1"], ((0, 0), (0, HIDDEN_PAD - HIDDEN)))  # f32

    # Pack and pad the two heads: rows 64..128 are zero (padded hidden),
    # columns [Wm | Ws | 0...] and [bm | bs | 0...].
    wh = jnp.concatenate([params["wm"], params["ws"]], axis=1)
    wh = jnp.pad(wh, ((0, HIDDEN_PAD - HIDDEN), (0, head_pad - 2 * outp))
                 ).astype(jnp.bfloat16)
    bh = jnp.concatenate([params["bm"], params["bs"]], axis=1)
    bh = jnp.pad(bh, ((0, 0), (0, head_pad - 2 * outp)))  # f32

    kernel = functools.partial(actor_kernel, outp=outp)

    out = pl.pallas_call(
        kernel,
        out_shape=jax.ShapeDtypeStruct((B_pad, head_pad), jnp.float32),
        grid=(B_pad // TB,),
        in_specs=[
            pl.BlockSpec((TB, inp), lambda i: (i, 0)),               # x (streams)
            pl.BlockSpec((inp, HIDDEN_PAD), lambda i: (0, 0)),       # W1 (resident)
            pl.BlockSpec((1, HIDDEN_PAD), lambda i: (0, 0)),         # b1 (resident)
            pl.BlockSpec((HIDDEN_PAD, head_pad), lambda i: (0, 0)),  # [Wm|Ws] (resident)
            pl.BlockSpec((1, head_pad), lambda i: (0, 0)),           # [bm|bs] (resident)
        ],
        out_specs=pl.BlockSpec((TB, head_pad), lambda i: (i, 0)),
        compiler_params=pltpu.CompilerParams(
            dimension_semantics=("parallel",)),
    )(x_p, w1, b1, wh, bh)

    out = out[:B]
    mean = out[:, :outp]
    std = out[:, outp:2 * outp]
    return mean, std


def init_actor_params(key, inp, outp, hidden=HIDDEN):
    """Deterministic init mirroring the PyTorch module:
    weights ~ N(0, 0.1); biases keep PyTorch Linear default U(-1/sqrt(fan_in), +).
    Weights stored as (in_features, out_features) — transposed vs torch."""
    k1, k2, k3, kb1, kb2, kb3 = jax.random.split(key, 6)
    w1 = 0.1 * jax.random.normal(k1, (inp, hidden), dtype=jnp.float32)
    wm = 0.1 * jax.random.normal(k2, (hidden, outp), dtype=jnp.float32)
    ws = 0.1 * jax.random.normal(k3, (hidden, outp), dtype=jnp.float32)
    b1 = jax.random.uniform(kb1, (1, hidden), jnp.float32,
                            -1.0 / jnp.sqrt(inp), 1.0 / jnp.sqrt(inp))
    bm = jax.random.uniform(kb2, (1, outp), jnp.float32,
                            -1.0 / jnp.sqrt(hidden), 1.0 / jnp.sqrt(hidden))
    bs = jax.random.uniform(kb3, (1, outp), jnp.float32,
                            -1.0 / jnp.sqrt(hidden), 1.0 / jnp.sqrt(hidden))
    return {"w1": w1, "b1": b1, "wm": wm, "bm": bm, "ws": ws, "bs": bs}


def actor_net_reference(x, p):
    """Pure-JAX reference using the same bf16-operand / f32-accumulate recipe."""
    xb = x.astype(jnp.bfloat16)
    h = jnp.dot(xb, p["w1"].astype(jnp.bfloat16),
                preferred_element_type=jnp.float32) + p["b1"]
    h = jax.nn.relu(h)
    hb = h.astype(jnp.bfloat16)
    m = jnp.dot(hb, p["wm"].astype(jnp.bfloat16),
                preferred_element_type=jnp.float32) + p["bm"]
    s = jnp.dot(hb, p["ws"].astype(jnp.bfloat16),
                preferred_element_type=jnp.float32) + p["bs"]
    return jnp.tanh(m), jax.nn.softplus(s)


if __name__ == "__main__":
    INP, OUTP = 16, 4
    key = jax.random.PRNGKey(0)
    kx, kp, kx2 = jax.random.split(key, 3)
    params = init_actor_params(kp, INP, OUTP)

    # Small per-step batch (as in PPO rollout): B=2.
    x = jax.random.normal(kx, (2, INP), dtype=jnp.float32)
    mean, std = actor_net_forward(x, params)
    jax.block_until_ready((mean, std))
    mean_ref, std_ref = actor_net_reference(x, params)
    assert mean.shape == (2, OUTP) and std.shape == (2, OUTP)
    assert jnp.allclose(mean, mean_ref, atol=1e-3), "mean mismatch (B=2)"
    assert jnp.allclose(std, std_ref, atol=1e-3), "std mismatch (B=2)"
    assert bool(jnp.all(std > 0)), "softplus output must be positive"

    # Larger, non-multiple-of-tile batch to exercise the batch grid + padding.
    xl = jax.random.normal(kx2, (300, INP), dtype=jnp.float32)
    mean_l, std_l = actor_net_forward(xl, params)
    jax.block_until_ready((mean_l, std_l))
    mean_lr, std_lr = actor_net_reference(xl, params)
    assert mean_l.shape == (300, OUTP) and std_l.shape == (300, OUTP)
    assert jnp.allclose(mean_l, mean_lr, atol=1e-3), "mean mismatch (B=300)"
    assert jnp.allclose(std_l, std_lr, atol=1e-3), "std mismatch (B=300)"
    assert bool(jnp.all(std_l > 0)), "softplus output must be positive"

    print("KERNEL_OK")
</pallas_src>

<mosaic_0001>
module attributes {stable_mosaic.version = 11 : i64} {
  func.func @actor_kernel(%arg0: i32, %arg1: memref<8x16xbf16, #tpu.memory_space<vmem>>, %arg2: memref<16x128xbf16, #tpu.memory_space<vmem>>, %arg3: memref<1x128xf32, #tpu.memory_space<vmem>>, %arg4: memref<128x128xbf16, #tpu.memory_space<vmem>>, %arg5: memref<1x128xf32, #tpu.memory_space<vmem>>, %arg6: memref<8x128xf32, #tpu.memory_space<vmem>>) attributes {dimension_semantics = [#tpu.dimension_semantics<parallel>], iteration_bounds = array<i64: 1>, scalar_prefetch = 0 : i64, scratch_operands = 0 : i64, tpu.core_type = #tpu.core_type<tc>, window_params = [{transform_indices = @transform_0, window_bounds = array<i64: 8, 16>}, {pipeline_mode = #tpu.pipeline_mode<synchronous>, transform_indices = @transform_1, window_bounds = array<i64: 16, 128>}, {pipeline_mode = #tpu.pipeline_mode<synchronous>, transform_indices = @transform_2, window_bounds = array<i64: 1, 128>}, {pipeline_mode = #tpu.pipeline_mode<synchronous>, transform_indices = @transform_3, window_bounds = array<i64: 128, 128>}, {pipeline_mode = #tpu.pipeline_mode<synchronous>, transform_indices = @transform_4, window_bounds = array<i64: 1, 128>}, {transform_indices = @transform_5, window_bounds = array<i64: 8, 128>}]} {
    %c0 = arith.constant 0 : index
    %c0_0 = arith.constant 0 : index
    %0 = vector.load %arg1[%c0, %c0_0] : memref<8x16xbf16, #tpu.memory_space<vmem>>, vector<8x16xbf16>
    %c0_1 = arith.constant 0 : index
    %c0_2 = arith.constant 0 : index
    %1 = vector.load %arg2[%c0_1, %c0_2] : memref<16x128xbf16, #tpu.memory_space<vmem>>, vector<16x128xbf16>
    %cst = arith.constant dense<0.000000e+00> : vector<8x128xf32>
    %2 = tpu.matmul %0, %1, %cst {dimension_numbers = #tpu.dot_dimension_numbers<[1], [0], [0], [1], [0, 0, 1, 1], [], []>} : vector<8x16xbf16>, vector<16x128xbf16>, vector<8x128xf32> -> vector<8x128xf32>
    %c0_3 = arith.constant 0 : index
    %c0_4 = arith.constant 0 : index
    %3 = vector.load %arg3[%c0_3, %c0_4] : memref<1x128xf32, #tpu.memory_space<vmem>>, vector<1x128xf32>
    %4 = vector.broadcast %3 : vector<1x128xf32> to vector<8x128xf32>
    %5 = arith.addf %2, %4 : vector<8x128xf32>
    %cst_5 = arith.constant 0.000000e+00 : f32
    %6 = vector.broadcast %cst_5 : f32 to vector<8x128xf32>
    %7 = arith.maximumf %5, %6 : vector<8x128xf32>
    %8 = arith.truncf %7 : vector<8x128xf32> to vector<8x128xbf16>
    %c0_6 = arith.constant 0 : index
    %c0_7 = arith.constant 0 : index
    %9 = vector.load %arg4[%c0_6, %c0_7] : memref<128x128xbf16, #tpu.memory_space<vmem>>, vector<128x128xbf16>
    %cst_8 = arith.constant dense<0.000000e+00> : vector<8x128xf32>
    %10 = tpu.matmul %8, %9, %cst_8 {dimension_numbers = #tpu.dot_dimension_numbers<[1], [0], [0], [1], [0, 0, 1, 1], [], []>} : vector<8x128xbf16>, vector<128x128xbf16>, vector<8x128xf32> -> vector<8x128xf32>
    %c0_9 = arith.constant 0 : index
    %c0_10 = arith.constant 0 : index
    %11 = vector.load %arg5[%c0_9, %c0_10] : memref<1x128xf32, #tpu.memory_space<vmem>>, vector<1x128xf32>
    %12 = vector.broadcast %11 : vector<1x128xf32> to vector<8x128xf32>
    %13 = arith.addf %10, %12 : vector<8x128xf32>
    %14 = tpu.iota {dimensions = array<i32: 1>} : vector<8x128xi32>
    %c4_i32 = arith.constant 4 : i32
    %15 = vector.broadcast %c4_i32 : i32 to vector<8x128xi32>
    %16 = arith.cmpi slt, %14, %15 : vector<8x128xi32>
    %17 = math.tanh %13 : vector<8x128xf32>
    %cst_11 = arith.constant 2.000000e+01 : f32
    %18 = vector.broadcast %cst_11 : f32 to vector<8x128xf32>
    %19 = arith.cmpf ogt, %13, %18 : vector<8x128xf32>
    %cst_12 = arith.constant 2.000000e+01 : f32
    %20 = vector.broadcast %cst_12 : f32 to vector<8x128xf32>
    %21 = arith.minimumf %13, %20 : vector<8x128xf32>
    %22 = math.exp %21 : vector<8x128xf32>
    %23 = math.log1p %22 : vector<8x128xf32>
    %24 = arith.select %19, %13, %23 : vector<8x128xi1>, vector<8x128xf32>
    %25 = arith.select %16, %17, %24 : vector<8x128xi1>, vector<8x128xf32>
    %c0_13 = arith.constant 0 : index
    %c0_14 = arith.constant 0 : index
    %26 = vector.load %arg6[%c0_13, %c0_14] : memref<8x128xf32, #tpu.memory_space<vmem>>, vector<8x128xf32>
    tpu.vector_store %arg6[%c0_13, %c0_14], %25 {strides = array<i32>} : memref<8x128xf32, #tpu.memory_space<vmem>>, vector<8x128xf32>,
    return
  }
  func.func @transform_0(%arg0: i32) -> (i32, i32) {
    %c0_i32 = arith.constant 0 : i32
    %c0_i32_0 = arith.constant 0 : i32
    return %arg0, %c0_i32 : i32, i32
  }
  func.func @transform_1(%arg0: i32) -> (i32, i32) {
    %c0_i32 = arith.constant 0 : i32
    %c0_i32_0 = arith.constant 0 : i32
    %c0_i32_1 = arith.constant 0 : i32
    return %c0_i32, %c0_i32_0 : i32, i32
  }
  func.func @transform_2(%arg0: i32) -> (i32, i32) {
    %c0_i32 = arith.constant 0 : i32
    %c0_i32_0 = arith.constant 0 : i32
    %c0_i32_1 = arith.constant 0 : i32
    return %c0_i32, %c0_i32_0 : i32, i32
  }
  func.func @transform_3(%arg0: i32) -> (i32, i32) {
    %c0_i32 = arith.constant 0 : i32
    %c0_i32_0 = arith.constant 0 : i32
    %c0_i32_1 = arith.constant 0 : i32
    return %c0_i32, %c0_i32_0 : i32, i32
  }
  func.func @transform_4(%arg0: i32) -> (i32, i32) {
    %c0_i32 = arith.constant 0 : i32
    %c0_i32_0 = arith.constant 0 : i32
    %c0_i32_1 = arith.constant 0 : i32
    return %c0_i32, %c0_i32_0 : i32, i32
  }
  func.func @transform_5(%arg0: i32) -> (i32, i32) {
    %c0_i32 = arith.constant 0 : i32
    %c0_i32_0 = arith.constant 0 : i32
    return %arg0, %c0_i32 : i32, i32
  }
}

</mosaic_0001>

<bundles_post_ra>
// kernel: tpu_custom_call.1
= control target key start
LH: loop header
LB: loop body
LE: loop exit
PB: predicated region body
PF: predicated region fallthrough
CT: control target
= control target key end

     0   :  { %10 = vsyncpa [#allocation3], 0  ;;  %s484_s0 = inlined_call_operand.hbm [shape: bf16[8,16], index: 0, kind: input, shape index: {}]   ;;  %s485_s1 = inlined_call_operand.hbm [shape: bf16[16,128], index: 1, kind: input, shape index: {}]   ;;  %s486_s2 = inlined_call_operand.vmem [shape: f32[1,128], index: 2, kind: input, shape index: {}]   ;;  %s487_s3 = inlined_call_operand.hbm [shape: bf16[128,128], index: 3, kind: input, shape index: {}]   ;;  %s488_s4 = inlined_call_operand.vmem [shape: f32[1,128], index: 4, kind: input, shape index: {}]   ;;  %s489_s5 = inlined_call_operand.hbm [shape: f32[8,128], index: 5, kind: output, shape index: {}]  }
   0x1   :  { %11 = vsyncpa [#allocation6], 0 }
   0x2   :  { %12 = vsyncpa [#allocation4], 0  ;;  %s428_s18 = smov [#allocation5]  }
   0x3   :  { %s28_s19 = sshll.u32 %s428_s18, 4  ;;  %s29_s19 = int_to_ptr.vmem [resolvable:$true] %s28_s19 }
   0x4   :  { %s350_s20 = scalar_lea.vmem %s29_s19, 128  ;;  %p355_p1 = scmp.lt.s32.totalorder %s29_s19, %s29_s19 }
   0x5   :  { %p351_p0 = scmp.ne.s32.totalorder %s29_s19, %s350_s20  ;;  %p356_p2 = scmp.lt.s32.totalorder %s350_s20, %s350_s20 }
   0x7   :  { %p357_p3 = por %p356_p2, %p355_p1 }
   0x9   :  { %p358_p4 = pnand %p357_p3, %p351_p0 }
   0xb   :  { %361 = shalt.err (!%p358_p4)
}
   0xc   :  { %s429_s21 = smov 64   ;;  %s430_s22 = smov 4  }
   0xd   :  { %34 = dma.hbm_to_vmem [thread:$0]  %s485_s1, 128, %s29_s19, [#allocation6], %s429_s21, %s429_s21, %s430_s22  }
   0xe   :  { %s431_s25 = smov [#allocation2]   ;;  %s432_s27 = smov [#allocation7]  }
   0xf   :  { %s19_s26 = sshll.u32 %s431_s25, 4  ;;  %s42_s28 = sshll.u32 %s432_s27, 4  ;;  %s20_s26 = int_to_ptr.vmem [resolvable:$true] %s19_s26  ;;  %s43_s28 = int_to_ptr.vmem [resolvable:$true] %s42_s28 }
  0x10   :  { %s370_s29 = scalar_lea.vmem %s20_s26, 64  ;;  %p375_p6 = scmp.lt.s32.totalorder %s20_s26, %s20_s26 }
  0x11   :  { %p371_p5 = scmp.ne.s32.totalorder %s20_s26, %s370_s29  ;;  %p376_p7 = scmp.lt.s32.totalorder %s370_s29, %s370_s29 }
  0x13   :  { %p377_p8 = por %p376_p7, %p375_p6 }
  0x15   :  { %p378_p9 = pnand %p377_p8, %p371_p5 }
  0x17   :  { %381 = shalt.err (!%p378_p9)
}
  0x18   :  { %22 = dma.hbm_to_vmem [thread:$0]  %s484_s0, 64, %s20_s26, [#allocation3]  }
  0x19   :  { %s390_s7 = scalar_lea.vmem %s43_s28, 1024  ;;  %p395_p11 = scmp.lt.s32.totalorder %s43_s28, %s43_s28 }
  0x1a   :  { %p391_p10 = scmp.ne.s32.totalorder %s43_s28, %s390_s7  ;;  %p396_p12 = scmp.lt.s32.totalorder %s390_s7, %s390_s7 }
  0x1c   :  { %p397_p13 = por %p396_p12, %p395_p11 }
  0x1e   :  { %p398_p0 = pnand %p397_p13, %p391_p10 }
  0x20   :  { %401 = shalt.err (!%p398_p0)
}
  0x21   :  { %48 = dma.hbm_to_vmem [thread:$0]  %s487_s3, 1024, %s43_s28, [#allocation6], %s429_s21, %s429_s21, %s430_s22  }
  0x22   :  { %422 = dma.done.wait [#allocation3], 64  }
  0x23   :  { %423 = vsyncadd [#allocation3], 4294967232 }
  0x24   :  { %424 = dma.done.wait [#allocation6], 1152  }
  0x25   :  { %425 = vsyncadd [#allocation6], 4294966144  ;;  %v433_v0 = vmov 0.0   ;;  %vm434_vm0 = vmmov 0   ;;  %v327_v1 = vld [vmem:[#allocation5] sm:$0xff]   ;;  %vm77_vm1 = vcmask 130048   ;;  %v234_v30 = vlaneseq }
  0x26   :  { %293 = vmatprep.subr.bf16.mxu0 %v433_v0  ;;  %295 = vmatprep.mubr.msk.bf16.mxu0 %vm434_vm0, %v433_v0  ;;  %v61_v2 = vld [vmem:[#allocation2] sm:$0xf]  ;;  %v328_v3 = vld [vmem:[#allocation7 + $0x38] sm:$0xff]   ;;  %v330_v5 = vld [vmem:[#allocation7 + $0x28] sm:$0xff]  }
  0x27   :  { %299 = vmatprep.subr.bf16.mxu1 %v433_v0  ;;  %315 = vmatprep.mubr.msk.bf16.mxu1 %vm434_vm0, %v433_v0  ;;  %v329_v4 = vld [vmem:[#allocation7 + $0x30] sm:$0xff]   ;;  %v331_v6 = vld [vmem:[#allocation7 + $0x20] sm:$0xff]   ;;  %v332_v7 = vld [vmem:[#allocation7 + $0x18] sm:$0xff]   ;;  %v235_v32 = vand.u32 127, %v234_v30 }
  0x28   :  { %294 = vmatpush3.bf16.msra.mxu0 %v327_v1  ;;  %300 = vmatpush3.bf16.msra.mxu1 %v328_v3  ;;  %v333_v8 = vld [vmem:[#allocation7 + $0x10] sm:$0xff]   ;;  %v334_v9 = vld [vmem:[#allocation7 + $0x8] sm:$0xff]   ;;  %v335_v10 = vld [vmem:[#allocation7] sm:$0xff]  }
  0x29   :  { %301 = vmatprep.subr.bf16.mxu1 %v433_v0  ;;  %v270_v11 = vld [vmem:[%s486_s2] ss:$0 sm:$0xff]  ;;  %s435_s2 = smov [#allocation8]   ;;  %vm236_vm2 = vcmp.lt.s32.totalorder %v235_v32, 4 }
  0x2a   :  { %v273_v19 = vld [vmem:[%s488_s4] ss:$0 sm:$0xff]  ;;  %s260_s4 = sshll.u32 %s435_s2, 4  ;;  %s261_s4 = int_to_ptr.vmem [resolvable:$true] %s260_s4 }
  0x2b   :  { %296 = vmatmul.mubr.msk.bf16.vlgmr.msra.gmra.mxu0 %vm77_vm1, %v61_v2  ;;  %s402_s11 = scalar_lea.vmem %s261_s4, 128  ;;  %p407_p2 = scmp.lt.s32.totalorder %s261_s4, %s261_s4 }
  0x2c   :  { %302 = vmatpush3.bf16.msra.mxu1 %v329_v4  ;;  %p403_p1 = scmp.ne.s32.totalorder %s261_s4, %s402_s11  ;;  %p408_p3 = scmp.lt.s32.totalorder %s402_s11, %s402_s11 }
  0x2d   :  { %303 = vmatprep.subr.bf16.mxu1 %v433_v0 }
  0x2e   :  { %p409_p4 = por %p408_p3, %p407_p2 }
  0x30   :  { %304 = vmatpush3.bf16.msra.mxu1 %v330_v5  ;;  %p410_p5 = pnand %p409_p4, %p403_p1 }
  0x31   :  { %305 = vmatprep.subr.bf16.mxu1 %v433_v0 }
  0x34   :  { %306 = vmatpush3.bf16.msra.mxu1 %v331_v6 }
  0x35   :  { %307 = vmatprep.subr.bf16.mxu1 %v433_v0 }
  0x38   :  { %308 = vmatpush3.bf16.msra.mxu1 %v332_v7 }
  0x39   :  { %309 = vmatprep.subr.bf16.mxu1 %v433_v0 }
  0x3c   :  { %310 = vmatpush3.bf16.msra.mxu1 %v333_v8 }
  0x3d   :  { %311 = vmatprep.subr.bf16.mxu1 %v433_v0 }
  0x40   :  { %312 = vmatpush3.bf16.msra.mxu1 %v334_v9 }
  0x41   :  { %313 = vmatprep.subr.bf16.mxu1 %v433_v0 }
  0x44   :  { %314 = vmatpush3.bf16.msra.mxu1 %v335_v10 }
  0xeb   :  { %v115_v12 = vpop.f32.mrf.mxu0 }
  0xec   :  { %v116_v13 = vadd.f32 %v270_v11, %v115_v12 }
  0xed   :  { %v297_v14 = vpop.f32.mrf.mxu0 }
  0xee   :  { %v121_v15 = vmax.f32 %v116_v13, 0.0 }
  0xef   :  { %v118_v16 = vpop.f32.mrf.mxu0 }
  0xf0   :  { %v122_v17 = vpack.c.bf16 %v121_v15, %v121_v15 }
  0xf1   :  { %v298_v18 = vpop.f32.mrf.mxu0 }
  0xf2   :  { %316 = vmatmul.mubr.bf16.vlgmr.msra.gmra.mxu1 %v122_v17 }
 0x1b2   :  { %v228_v20 = vpop.f32.mrf.mxu1 }
 0x1b3   :  { %v229_v21 = vadd.f32 %v273_v19, %v228_v20 }
 0x1b4   :  { %v317_v22 = vpop.f32.mrf.mxu1 }
 0x1b5   :  { %v239_v23 = vmin.f32 %v229_v21, 20.0  ;;  %vm238_vm4 = vcmp.gt.f32.partialorder %v229_v21, 20.0 }
 0x1b6   :  { %v231_v24 = vpop.f32.mrf.mxu1 }
 0x1b7   :  { %v240_v25 = vmul.f32 1.442695, %v239_v23 }
 0x1b8   :  { %v318_v26 = vpop.f32.mrf.mxu1 }
 0x1b9   :  { %336 = vpow2.f32 %v240_v25 }
 0x1c6   :  { %v337_v27 = vpop.eup %336 }
 0x1c7   :  { %v242_v28 = vadd.f32 1.0, %v337_v27  ;;  %v245_v29 = vmul.f32 -0.5, %v337_v27  ;;  %v248_v33 = vand.u32 2147483647, %v337_v27 }
 0x1c9   :  { %338 = vlog2.f32 %v242_v28  ;;  %v246_v31 = vadd.f32 1.0, %v245_v29  ;;  %vm249_vm3 = vcmp.lt.f32.partialorder %v248_v33, 0.0004427343 }
 0x1ca   :  { %340 = vtanh.f32 %v229_v21 }
 0x1cb   :  { %v247_v36 = vmul.f32 %v337_v27, %v246_v31 }
 0x1d6   :  { %v339_v34 = vpop.eup %338 }
 0x1d7   :  { %v244_v35 = vmul.f32 0.6931472, %v339_v34  ;;  %v341_v38 = vpop.eup %340 }
 0x1d9   :  { %v250_v37 = vsel %vm249_vm3, %v247_v36, %v244_v35 }
 0x1da   :  { %v251_v39 = vsel %vm238_vm4, %v229_v21, %v250_v37 }
 0x1db   :  { %v252_v40 = vsel %vm236_vm2, %v341_v38, %v251_v39 }
 0x1dc   :  { %253 = vst [vmem:[#allocation8] sm:$0xff] %v252_v40 }
 0x1dd   :  { %413 = shalt.err (!%p410_p5)
}
 0x1de   :  { %263 = dma.vmem_to_hbm [thread:$0]  %s261_s4, 128, %s489_s5, [#allocation4]  }
 0x1df   :  { %426 = dma.done.wait [#allocation4], 128  }
 0x1e0   :  { %427 = vsyncadd [#allocation4], 4294967168 }
 0x1e1   :  { %267 = vsyncpa [#allocation3], 1 }
 0x1e2   :  { %268 = vsyncpa [#allocation6], 1 }
 0x1e3   :  { %269 = vsyncpa [#allocation4], 1 }

</bundles_post_ra>
